<compile_context>
chip_gen: v7x
topology: tpu7x:2x2x1
jax: 0.10.0
libtpu: 0.0.40
codegen_flags: <defaults>
</compile_context>

<pallas_src>
import functools

import jax
import jax.numpy as jnp
from jax.experimental import pallas as pl
from jax.experimental.pallas import tpu as pltpu

_LANE = 128
_SUBLANE = 8
_MAX_TN = 2048  # lane-dense tile width for the final layer (multiple of 128)


def _round_up(x, m):
    return (x + m - 1) // m * m


def _gen_kernel(noise_ref, text_ref, w1n_ref, w1t_ref, b1_ref,
                w2_ref, b2_ref, w3_ref, b3_ref, o_ref):
    """One out_dim tile of the fused MLP.

    Layers 1+2 (48 -> 256 -> 512 at Bp=8 rows) are recomputed per tile from the
    VMEM-resident small weights; this is free relative to streaming the
    (512, TN) bf16 W3 tile from HBM and keeps the kernel correct when the
    out_dim grid axis is split across TensorCores ("parallel").
    """
    nz = noise_ref[...].astype(jnp.bfloat16)
    tx = text_ref[...].astype(jnp.bfloat16)
    # cat([noise, text]) @ W1  ==  noise @ W1[:nd] + text @ W1[nd:]
    h1 = (jnp.dot(nz, w1n_ref[...], preferred_element_type=jnp.float32)
          + jnp.dot(tx, w1t_ref[...], preferred_element_type=jnp.float32)
          + b1_ref[...])
    h1 = jnp.maximum(h1, 0.0).astype(jnp.bfloat16)                        # ReLU
    h2 = jnp.dot(h1, w2_ref[...], preferred_element_type=jnp.float32) + b2_ref[...]
    h2 = jnp.maximum(h2, 0.0).astype(jnp.bfloat16)                        # ReLU
    y = jnp.dot(h2, w3_ref[...], preferred_element_type=jnp.float32) + b3_ref[...]
    o_ref[...] = jnp.tanh(y).astype(o_ref.dtype)                          # Tanh


@functools.partial(jax.jit, static_argnames=("image_size",))
def stage1_generator_forward(noise, text_embedding, params, image_size):
    """Matches Stage1Generator.forward: concat -> fc stack -> view(-1, 3, H, W)."""
    w1n, w1t, b1, w2, b2, w3, b3 = params
    B, noise_dim = noise.shape
    text_dim = text_embedding.shape[1]
    hidden = w2.shape[1]                       # 512
    out_dim = image_size * image_size * 3
    out_dim_p = w3.shape[1]                    # zero-padded to a tile multiple
    assert out_dim_p % _LANE == 0 and out_dim_p >= out_dim

    # Pad batch to a multiple of 8 sublanes (free; extra rows sliced off below).
    bp = max(_SUBLANE, _round_up(B, _SUBLANE))
    noise_p = jnp.pad(noise, ((0, bp - B), (0, 0)))
    text_p = jnp.pad(text_embedding, ((0, bp - B), (0, 0)))

    # Lane-dense tiling of the final (dominant, HBM-bound) layer over out_dim.
    tn = min(_MAX_TN, out_dim_p)
    assert out_dim_p % tn == 0
    grid = (out_dim_p // tn,)

    full = lambda j: (0, 0)                    # constant index -> DMA'd once, VMEM-resident
    flat = pl.pallas_call(
        _gen_kernel,
        out_shape=jax.ShapeDtypeStruct((bp, out_dim_p), jnp.float32),
        grid=grid,
        in_specs=[
            pl.BlockSpec((bp, noise_dim), full),
            pl.BlockSpec((bp, text_dim), full),
            pl.BlockSpec(w1n.shape, full),
            pl.BlockSpec(w1t.shape, full),
            pl.BlockSpec(b1.shape, full),
            pl.BlockSpec(w2.shape, full),
            pl.BlockSpec(b2.shape, full),
            pl.BlockSpec((hidden, tn), lambda j: (0, j)),   # streamed bf16 W3 tile
            pl.BlockSpec((1, tn), lambda j: (0, j)),
        ],
        out_specs=pl.BlockSpec((bp, tn), lambda j: (0, j)),
        compiler_params=pltpu.CompilerParams(
            dimension_semantics=("parallel",)),   # v7x: 2 TCs each stream half of W3
    )(noise_p, text_p, w1n, w1t, b1, w2, b2, w3, b3)

    # Drop batch / out_dim padding; same semantics as torch .view(-1, 3, H, W).
    return flat[:B, :out_dim].reshape(B, 3, image_size, image_size)


def init_params(key, text_embedding_dim, noise_dim, image_size):
    """nn.Linear-default init (U[-1/sqrt(fan_in), +]), laid out for the kernel:

      * weights transposed to (in, out) and stored in bf16 (halves HBM bytes);
      * biases kept f32 as (1, out) lane rows;
      * W1 pre-split into its noise / text row blocks (replaces the concat);
      * W3/b3 columns zero-padded to a multiple of the lane tile width
        (padding is sliced off in the wrapper).
    """
    d_in = text_embedding_dim + noise_dim
    dims = [d_in, 256, 512, image_size * image_size * 3]
    raw = []
    for i in range(3):
        key, kw, kb = jax.random.split(key, 3)
        bound = 1.0 / float(dims[i]) ** 0.5
        w = jax.random.uniform(kw, (dims[i], dims[i + 1]), jnp.float32, -bound, bound)
        b = jax.random.uniform(kb, (1, dims[i + 1]), jnp.float32, -bound, bound)
        raw += [w, b]
    w1, b1, w2, b2, w3, b3 = raw

    out_dim = dims[3]
    out_dim_128 = _round_up(out_dim, _LANE)
    tn = min(_MAX_TN, out_dim_128)
    out_dim_p = _round_up(out_dim_128, tn)
    w3 = jnp.pad(w3, ((0, 0), (0, out_dim_p - out_dim)))
    b3 = jnp.pad(b3, ((0, 0), (0, out_dim_p - out_dim)))

    w1n = w1[:noise_dim].astype(jnp.bfloat16)
    w1t = w1[noise_dim:].astype(jnp.bfloat16)
    return (w1n, w1t, b1,
            w2.astype(jnp.bfloat16), b2,
            w3.astype(jnp.bfloat16), b3)


if __name__ == "__main__":
    TEXT_DIM = 32
    NOISE_DIM = 16
    IMAGE_SIZE = 16
    BATCH = 2

    key = jax.random.PRNGKey(0)
    k_noise, k_text, k_params = jax.random.split(key, 3)

    noise = jax.random.normal(k_noise, (BATCH, NOISE_DIM), jnp.float32)
    text_embedding = jax.random.normal(k_text, (BATCH, TEXT_DIM), jnp.float32)
    params = init_params(k_params, TEXT_DIM, NOISE_DIM, IMAGE_SIZE)

    out = stage1_generator_forward(noise, text_embedding, params, IMAGE_SIZE)
    out = jax.block_until_ready(out)

    # Sanity checks: shape matches torch view(-1, 3, H, W); tanh range.
    assert out.shape == (BATCH, 3, IMAGE_SIZE, IMAGE_SIZE), out.shape
    assert bool(jnp.all(jnp.abs(out) <= 1.0))

    # Reference: same math in plain JAX (f32 activations, bf16 weights upcast).
    w1n, w1t, b1, w2, b2, w3, b3 = params
    x = jnp.concatenate([noise, text_embedding], axis=1)
    w1_full = jnp.concatenate([w1n, w1t], axis=0).astype(jnp.float32)
    h = jnp.maximum(x @ w1_full + b1, 0.0)
    h = jnp.maximum(h @ w2.astype(jnp.float32) + b2, 0.0)
    y = jnp.tanh(h @ w3.astype(jnp.float32) + b3)
    ref = y[:, : 3 * IMAGE_SIZE * IMAGE_SIZE].reshape(
        BATCH, 3, IMAGE_SIZE, IMAGE_SIZE)
    # bf16 activation casts inside the kernel -> loosened tolerance vs f32 ref.
    assert bool(jnp.allclose(out, ref, atol=2e-2, rtol=2e-2))

    print("KERNEL_OK")
</pallas_src>

<mosaic_0001>
module attributes {stable_mosaic.version = 11 : i64} {
  func.func @_gen_kernel(%arg0: i32, %arg1: memref<8x16xf32, #tpu.memory_space<vmem>>, %arg2: memref<8x32xf32, #tpu.memory_space<vmem>>, %arg3: memref<16x256xbf16, #tpu.memory_space<vmem>>, %arg4: memref<32x256xbf16, #tpu.memory_space<vmem>>, %arg5: memref<1x256xf32, #tpu.memory_space<vmem>>, %arg6: memref<256x512xbf16, #tpu.memory_space<vmem>>, %arg7: memref<1x512xf32, #tpu.memory_space<vmem>>, %arg8: memref<512x768xbf16, #tpu.memory_space<vmem>>, %arg9: memref<1x768xf32, #tpu.memory_space<vmem>>, %arg10: memref<8x768xf32, #tpu.memory_space<vmem>>) attributes {dimension_semantics = [#tpu.dimension_semantics<parallel>], iteration_bounds = array<i64: 1>, scalar_prefetch = 0 : i64, scratch_operands = 0 : i64, tpu.core_type = #tpu.core_type<tc>, window_params = [{pipeline_mode = #tpu.pipeline_mode<synchronous>, transform_indices = @transform_0, window_bounds = array<i64: 8, 16>}, {pipeline_mode = #tpu.pipeline_mode<synchronous>, transform_indices = @transform_1, window_bounds = array<i64: 8, 32>}, {pipeline_mode = #tpu.pipeline_mode<synchronous>, transform_indices = @transform_2, window_bounds = array<i64: 16, 256>}, {pipeline_mode = #tpu.pipeline_mode<synchronous>, transform_indices = @transform_3, window_bounds = array<i64: 32, 256>}, {pipeline_mode = #tpu.pipeline_mode<synchronous>, transform_indices = @transform_4, window_bounds = array<i64: 1, 256>}, {pipeline_mode = #tpu.pipeline_mode<synchronous>, transform_indices = @transform_5, window_bounds = array<i64: 256, 512>}, {pipeline_mode = #tpu.pipeline_mode<synchronous>, transform_indices = @transform_6, window_bounds = array<i64: 1, 512>}, {transform_indices = @transform_7, window_bounds = array<i64: 512, 768>}, {transform_indices = @transform_8, window_bounds = array<i64: 1, 768>}, {transform_indices = @transform_9, window_bounds = array<i64: 8, 768>}]} {
    %c0 = arith.constant 0 : index
    %c0_0 = arith.constant 0 : index
    %0 = vector.load %arg1[%c0, %c0_0] : memref<8x16xf32, #tpu.memory_space<vmem>>, vector<8x16xf32>
    %1 = arith.truncf %0 : vector<8x16xf32> to vector<8x16xbf16>
    %c0_1 = arith.constant 0 : index
    %c0_2 = arith.constant 0 : index
    %2 = vector.load %arg2[%c0_1, %c0_2] : memref<8x32xf32, #tpu.memory_space<vmem>>, vector<8x32xf32>
    %3 = arith.truncf %2 : vector<8x32xf32> to vector<8x32xbf16>
    %c0_3 = arith.constant 0 : index
    %c0_4 = arith.constant 0 : index
    %4 = vector.load %arg3[%c0_3, %c0_4] : memref<16x256xbf16, #tpu.memory_space<vmem>>, vector<16x256xbf16>
    %cst = arith.constant dense<0.000000e+00> : vector<8x256xf32>
    %5 = tpu.matmul %1, %4, %cst {dimension_numbers = #tpu.dot_dimension_numbers<[1], [0], [0], [1], [0, 0, 1, 1], [], []>} : vector<8x16xbf16>, vector<16x256xbf16>, vector<8x256xf32> -> vector<8x256xf32>
    %c0_5 = arith.constant 0 : index
    %c0_6 = arith.constant 0 : index
    %6 = vector.load %arg4[%c0_5, %c0_6] : memref<32x256xbf16, #tpu.memory_space<vmem>>, vector<32x256xbf16>
    %cst_7 = arith.constant dense<0.000000e+00> : vector<8x256xf32>
    %7 = tpu.matmul %3, %6, %cst_7 {dimension_numbers = #tpu.dot_dimension_numbers<[1], [0], [0], [1], [0, 0, 1, 1], [], []>} : vector<8x32xbf16>, vector<32x256xbf16>, vector<8x256xf32> -> vector<8x256xf32>
    %8 = arith.addf %5, %7 : vector<8x256xf32>
    %c0_8 = arith.constant 0 : index
    %c0_9 = arith.constant 0 : index
    %9 = vector.load %arg5[%c0_8, %c0_9] : memref<1x256xf32, #tpu.memory_space<vmem>>, vector<1x256xf32>
    %10 = vector.broadcast %9 : vector<1x256xf32> to vector<8x256xf32>
    %11 = arith.addf %8, %10 : vector<8x256xf32>
    %cst_10 = arith.constant 0.000000e+00 : f32
    %12 = vector.broadcast %cst_10 : f32 to vector<8x256xf32>
    %13 = arith.maximumf %11, %12 : vector<8x256xf32>
    %14 = arith.truncf %13 : vector<8x256xf32> to vector<8x256xbf16>
    %c0_11 = arith.constant 0 : index
    %c0_12 = arith.constant 0 : index
    %15 = vector.load %arg6[%c0_11, %c0_12] : memref<256x512xbf16, #tpu.memory_space<vmem>>, vector<256x512xbf16>
    %cst_13 = arith.constant dense<0.000000e+00> : vector<8x512xf32>
    %16 = tpu.matmul %14, %15, %cst_13 {dimension_numbers = #tpu.dot_dimension_numbers<[1], [0], [0], [1], [0, 0, 1, 1], [], []>} : vector<8x256xbf16>, vector<256x512xbf16>, vector<8x512xf32> -> vector<8x512xf32>
    %c0_14 = arith.constant 0 : index
    %c0_15 = arith.constant 0 : index
    %17 = vector.load %arg7[%c0_14, %c0_15] : memref<1x512xf32, #tpu.memory_space<vmem>>, vector<1x512xf32>
    %18 = vector.broadcast %17 : vector<1x512xf32> to vector<8x512xf32>
    %19 = arith.addf %16, %18 : vector<8x512xf32>
    %cst_16 = arith.constant 0.000000e+00 : f32
    %20 = vector.broadcast %cst_16 : f32 to vector<8x512xf32>
    %21 = arith.maximumf %19, %20 : vector<8x512xf32>
    %22 = arith.truncf %21 : vector<8x512xf32> to vector<8x512xbf16>
    %c0_17 = arith.constant 0 : index
    %c0_18 = arith.constant 0 : index
    %23 = vector.load %arg8[%c0_17, %c0_18] : memref<512x768xbf16, #tpu.memory_space<vmem>>, vector<512x768xbf16>
    %cst_19 = arith.constant dense<0.000000e+00> : vector<8x768xf32>
    %24 = tpu.matmul %22, %23, %cst_19 {dimension_numbers = #tpu.dot_dimension_numbers<[1], [0], [0], [1], [0, 0, 1, 1], [], []>} : vector<8x512xbf16>, vector<512x768xbf16>, vector<8x768xf32> -> vector<8x768xf32>
    %c0_20 = arith.constant 0 : index
    %c0_21 = arith.constant 0 : index
    %25 = vector.load %arg9[%c0_20, %c0_21] : memref<1x768xf32, #tpu.memory_space<vmem>>, vector<1x768xf32>
    %26 = vector.broadcast %25 : vector<1x768xf32> to vector<8x768xf32>
    %27 = arith.addf %24, %26 : vector<8x768xf32>
    %28 = math.tanh %27 : vector<8x768xf32>
    %c0_22 = arith.constant 0 : index
    %c0_23 = arith.constant 0 : index
    %29 = vector.load %arg10[%c0_22, %c0_23] : memref<8x768xf32, #tpu.memory_space<vmem>>, vector<8x768xf32>
    tpu.vector_store %arg10[%c0_22, %c0_23], %28 {strides = array<i32>} : memref<8x768xf32, #tpu.memory_space<vmem>>, vector<8x768xf32>,
    return
  }
  func.func @transform_0(%arg0: i32) -> (i32, i32) {
    %c0_i32 = arith.constant 0 : i32
    %c0_i32_0 = arith.constant 0 : i32
    %c0_i32_1 = arith.constant 0 : i32
    return %c0_i32, %c0_i32_0 : i32, i32
  }
  func.func @transform_1(%arg0: i32) -> (i32, i32) {
    %c0_i32 = arith.constant 0 : i32
    %c0_i32_0 = arith.constant 0 : i32
    %c0_i32_1 = arith.constant 0 : i32
    return %c0_i32, %c0_i32_0 : i32, i32
  }
  func.func @transform_2(%arg0: i32) -> (i32, i32) {
    %c0_i32 = arith.constant 0 : i32
    %c0_i32_0 = arith.constant 0 : i32
    %c0_i32_1 = arith.constant 0 : i32
    return %c0_i32, %c0_i32_0 : i32, i32
  }
  func.func @transform_3(%arg0: i32) -> (i32, i32) {
    %c0_i32 = arith.constant 0 : i32
    %c0_i32_0 = arith.constant 0 : i32
    %c0_i32_1 = arith.constant 0 : i32
    return %c0_i32, %c0_i32_0 : i32, i32
  }
  func.func @transform_4(%arg0: i32) -> (i32, i32) {
    %c0_i32 = arith.constant 0 : i32
    %c0_i32_0 = arith.constant 0 : i32
    %c0_i32_1 = arith.constant 0 : i32
    return %c0_i32, %c0_i32_0 : i32, i32
  }
  func.func @transform_5(%arg0: i32) -> (i32, i32) {
    %c0_i32 = arith.constant 0 : i32
    %c0_i32_0 = arith.constant 0 : i32
    %c0_i32_1 = arith.constant 0 : i32
    return %c0_i32, %c0_i32_0 : i32, i32
  }
  func.func @transform_6(%arg0: i32) -> (i32, i32) {
    %c0_i32 = arith.constant 0 : i32
    %c0_i32_0 = arith.constant 0 : i32
    %c0_i32_1 = arith.constant 0 : i32
    return %c0_i32, %c0_i32_0 : i32, i32
  }
  func.func @transform_7(%arg0: i32) -> (i32, i32) {
    %c0_i32 = arith.constant 0 : i32
    %c0_i32_0 = arith.constant 0 : i32
    return %c0_i32, %arg0 : i32, i32
  }
  func.func @transform_8(%arg0: i32) -> (i32, i32) {
    %c0_i32 = arith.constant 0 : i32
    %c0_i32_0 = arith.constant 0 : i32
    return %c0_i32, %arg0 : i32, i32
  }
  func.func @transform_9(%arg0: i32) -> (i32, i32) {
    %c0_i32 = arith.constant 0 : i32
    %c0_i32_0 = arith.constant 0 : i32
    return %c0_i32, %arg0 : i32, i32
  }
}

</mosaic_0001>

<bundles_post_ra>
// kernel: stage1_generator_forward.1
= control target key start
LH: loop header
LB: loop body
LE: loop exit
PB: predicated region body
PF: predicated region fallthrough
CT: control target
= control target key end

     0   :  { %14 = vsyncpa [#allocation3], 0  ;;  %s3130_s0 = inlined_call_operand.vmem [shape: f32[8,16], index: 0, kind: input, shape index: {}]   ;;  %s3131_s1 = inlined_call_operand.vmem [shape: f32[8,32], index: 1, kind: input, shape index: {}]   ;;  %s3132_s2 = inlined_call_operand.hbm [shape: bf16[16,256], index: 2, kind: input, shape index: {}]   ;;  %s3133_s3 = inlined_call_operand.vmem [shape: bf16[32,256], index: 3, kind: input, shape index: {}]   ;;  %s3134_s4 = inlined_call_operand.vmem [shape: f32[1,256], index: 4, kind: input, shape index: {}]   ;;  %s3135_s5 = inlined_call_operand.hbm [shape: bf16[256,512], index: 5, kind: input, shape index: {}]   ;;  %s3136_s6 = inlined_call_operand.vmem [shape: f32[1,512], index: 6, kind: input, shape index: {}]   ;;  %s3137_s7 = inlined_call_operand.hbm [shape: bf16[512,768], index: 7, kind: input, shape index: {}]   ;;  %s3138_s8 = inlined_call_operand.vmem [shape: f32[1,768], index: 8, kind: input, shape index: {}]   ;;  %s3139_s9 = inlined_call_operand.vmem [shape: f32[8,768], index: 9, kind: output, shape index: {}]  }
   0x1   :  { %15 = vsyncpa [#allocation5], 0  ;;  %s2933_s30 = smov [#allocation4]   ;;  %s2863_s13 = scalar_lea.hbm %s3135_s5, 8192 }
   0x2   :  { %s41_s10 = sshll.u32 %s2933_s30, 4  ;;  %p2864_p0 = scmp.ne.s32.totalorder %s3135_s5, %s2863_s13  ;;  %s42_s10 = int_to_ptr.vmem [resolvable:$true] %s41_s10 }
   0x3   :  { %p2867_p1 = scmp.lt.u32.totalorder %s2863_s13, %s3135_s5 }
   0x5   :  { %p2869_p2 = pnand %p2867_p1, %p2864_p0 }
   0x7   :  { %2872 = shalt.err (!%p2869_p2)
}
   0x8   :  { %s2873_s18 = scalar_lea.vmem %s42_s10, 8192  ;;  %p2878_p4 = scmp.lt.s32.totalorder %s42_s10, %s42_s10 }
   0x9   :  { %p2874_p3 = scmp.ne.s32.totalorder %s42_s10, %s2873_s18  ;;  %p2879_p5 = scmp.lt.s32.totalorder %s2873_s18, %s2873_s18 }
   0xb   :  { %p2880_p6 = por %p2879_p5, %p2878_p4 }
   0xd   :  { %p2881_p7 = pnand %p2880_p6, %p2874_p3 }
   0xf   :  { %2884 = shalt.err (!%p2881_p7)
}
  0x10   :  { %s2934_s19 = smov 256   ;;  %s2935_s20 = smov 16  }
  0x11   :  { %47 = dma.hbm_to_vmem [thread:$0]  %s3135_s5, 8192, %s42_s10, [#allocation5], %s2934_s19, %s2934_s19, %s2935_s20  }
  0x12   :  { %s2936_s23 = smov [#allocation2]   ;;  %s2885_s27 = scalar_lea.hbm %s3132_s2, 256 }
  0x13   :  { %s25_s24 = sshll.u32 %s2936_s23, 4  ;;  %p2886_p8 = scmp.ne.s32.totalorder %s3132_s2, %s2885_s27  ;;  %s26_s24 = int_to_ptr.vmem [resolvable:$true] %s25_s24 }
  0x14   :  { %p2889_p9 = scmp.lt.u32.totalorder %s2885_s27, %s3132_s2 }
  0x16   :  { %p2891_p10 = pnand %p2889_p9, %p2886_p8 }
  0x18   :  { %2894 = shalt.err (!%p2891_p10)
}
  0x19   :  { %s2895_s12 = scalar_lea.vmem %s26_s24, 256  ;;  %p2900_p12 = scmp.lt.s32.totalorder %s26_s24, %s26_s24 }
  0x1a   :  { %p2896_p11 = scmp.ne.s32.totalorder %s26_s24, %s2895_s12  ;;  %p2901_p13 = scmp.lt.s32.totalorder %s2895_s12, %s2895_s12 }
  0x1c   :  { %p2902_p0 = por %p2901_p13, %p2900_p12 }
  0x1e   :  { %p2903_p1 = pnand %p2902_p0, %p2896_p11 }
  0x20   :  { %2906 = shalt.err (!%p2903_p1)
}
  0x21   :  { %s2937_s5 = smov 128   ;;  %s2938_s10 = smov 8  }
  0x22   :  { %31 = dma.hbm_to_vmem [thread:$0]  %s3132_s2, 256, %s26_s24, [#allocation3], %s2937_s5, %s2937_s5, %s2938_s10  }
  0x23   :  { %s2939_s15 = smov [#allocation6]   ;;  %s2907_s19 = scalar_lea.hbm %s3137_s7, 24576 }
  0x24   :  { %s55_s16 = sshll.u32 %s2939_s15, 4  ;;  %p2908_p2 = scmp.ne.s32.totalorder %s3137_s7, %s2907_s19  ;;  %s56_s16 = int_to_ptr.vmem [resolvable:$true] %s55_s16 }
  0x25   :  { %p2911_p3 = scmp.lt.u32.totalorder %s2907_s19, %s3137_s7 }
  0x27   :  { %p2913_p4 = pnand %p2911_p3, %p2908_p2 }
  0x29   :  { %2916 = shalt.err (!%p2913_p4)
}
  0x2a   :  { %s2917_s25 = scalar_lea.vmem %s56_s16, 24576  ;;  %p2922_p6 = scmp.lt.s32.totalorder %s56_s16, %s56_s16 }
  0x2b   :  { %p2918_p5 = scmp.ne.s32.totalorder %s56_s16, %s2917_s25  ;;  %p2923_p7 = scmp.lt.s32.totalorder %s2917_s25, %s2917_s25 }
  0x2d   :  { %p2924_p8 = por %p2923_p7, %p2922_p6 }
  0x2f   :  { %p2925_p9 = pnand %p2924_p8, %p2918_p5 }
  0x31   :  { %2928 = shalt.err (!%p2925_p9)
}
  0x32   :  { %s2940_s2 = smov 384   ;;  %s2941_s24 = smov 24  }
  0x33   :  { %61 = dma.hbm_to_vmem [thread:$0]  %s3137_s7, 24576, %s56_s16, [#allocation5], %s2940_s2, %s2940_s2, %s2941_s24  }
  0x34   :  { %2929 = dma.done.wait [#allocation3], 256  }
  0x35   :  { %2930 = vsyncadd [#allocation3], 4294967040 }
  0x36   :  { %2931 = dma.done.wait [#allocation5], 32768  }
  0x37   :  { %2932 = vsyncadd [#allocation5], 4294934528  ;;  %v2942_v0 = vmov 0   ;;  %v2458_v1 = vld [vmem:[%s3133_s3 + $0x4] ss:$8 sps:$4 sm:$0xff]   ;;  %vm159_vm0 = vcmask 130048  }
  0x38   :  { %195 = vmatprep.mubr.bf16.mxu1 %v2942_v0  ;;  %140 = vmatprep.mubr.bf16.mxu0 %v2942_v0  ;;  %v2460_v2 = vld [vmem:[%s3133_s3] ss:$8 sps:$4 sm:$0xff]   ;;  %v2461_v3 = vld [vmem:[#allocation2 + $0x4] ss:$8 sps:$4 sm:$0xff]   ;;  %v2463_v4 = vld [vmem:[#allocation2] ss:$8 sps:$4 sm:$0xff]  }
  0x39   :  { %108 = vmatprep.subr.bf16.mxu0 %v2458_v1  ;;  %v2464_v5 = vld [vmem:[%s3133_s3 + $0x14] ss:$8 sps:$4 sm:$0xff]   ;;  %v2466_v6 = vld [vmem:[%s3133_s3 + $0x10] ss:$8 sps:$4 sm:$0xff]   ;;  %163 = vmatprep.subr.bf16.mxu1 %v2461_v3  ;;  %v74_v7 = vld [vmem:[%s3130_s0] sm:$0xff]  ;;  %vm104_vm1 = vcmask 261120  }
  0x3a   :  { %109 = vmatpush1.bf16.msra.mxu0 %v2460_v2  ;;  %v76_v8 = vld [vmem:[%s3131_s1] sm:$0xff]  ;;  %164 = vmatpush1.bf16.msra.mxu1 %v2463_v4  ;;  %v75_v9 = vpack.c.bf16 %v74_v7, %v74_v7  ;;  %v2517_v43 = vld [vmem:[#allocation4 + $0xc] ss:$16 sps:$4 sm:$0xff]   ;;  %v2569_v47 = vld [vmem:[#allocation6 + $0x30] ss:$24 sps:$4 sm:$0xff]   ;;  %v206_v2 = vlaneseq }
  0x3b   :  { %110 = vmatprep.subr.bf16.mxu0 %v2464_v5  ;;  %v2469_v10 = vld [vmem:[#allocation4 + $0x4] ss:$16 sps:$4 sm:$0xff]   ;;  %v77_v11 = vpack.c.bf16 %v76_v8, %v76_v8  ;;  %v2467_v12 = vld [vmem:[#allocation4] ss:$16 sps:$4 sm:$0xff]  }
  0x3c   :  { %v2472_v13 = vld [vmem:[#allocation4 + $0x24] ss:$16 sps:$4 sm:$0xff]   ;;  %v2470_v14 = vld [vmem:[#allocation4 + $0x20] ss:$16 sps:$4 sm:$0xff]   ;;  %v3047_v5 = vshrl.u32 %v206_v2, 7 }
  0x3d   :  { %2173 = vmatmul.mubr.msk.bf16.vlgmr.msra.gmra.mrb[0].mxu1 %vm159_vm0, %v75_v9  ;;  %v2475_v15 = vld [vmem:[#allocation4 + $0x44] ss:$16 sps:$4 sm:$0xff]   ;;  %v2473_v16 = vld [vmem:[#allocation4 + $0x40] ss:$16 sps:$4 sm:$0xff]  }
  0x3e   :  { %111 = vmatpush1.bf16.msra.mxu0 %v2466_v6  ;;  %v2478_v17 = vld [vmem:[#allocation4 + $0x64] ss:$16 sps:$4 sm:$0xff]   ;;  %v2476_v18 = vld [vmem:[#allocation4 + $0x60] ss:$16 sps:$4 sm:$0xff]   ;;  %v3050_v8 = vsub.s32 0, %v3047_v5 }
  0x3f   :  { %628 = vmatprep.subr.bf16.mxu0 %v2469_v10  ;;  %v2481_v19 = vld [vmem:[#allocation4 + $0x84] ss:$16 sps:$4 sm:$0xff]   ;;  %v2479_v20 = vld [vmem:[#allocation4 + $0x80] ss:$16 sps:$4 sm:$0xff]   ;;  %v3056_v10 = vsub.s32 1, %v3047_v5 }
  0x40   :  { %v2484_v21 = vld [vmem:[#allocation4 + $0xa4] ss:$16 sps:$4 sm:$0xff]   ;;  %v2482_v22 = vld [vmem:[#allocation4 + $0xa0] ss:$16 sps:$4 sm:$0xff]  }
  0x41   :  { %2170 = vmatmul.mubr.msk.bf16.vlgmr.msra.gmra.mrb[0].mxu0 %vm104_vm1, %v77_v11  ;;  %v2487_v23 = vld [vmem:[#allocation4 + $0xc4] ss:$16 sps:$4 sm:$0xff]   ;;  %v2485_v24 = vld [vmem:[#allocation4 + $0xc0] ss:$16 sps:$4 sm:$0xff]  }
  0x42   :  { %629 = vmatpush1.bf16.msra.mxu0 %v2467_v12  ;;  %v2490_v25 = vld [vmem:[#allocation4 + $0xe4] ss:$16 sps:$4 sm:$0xff]   ;;  %v2488_v26 = vld [vmem:[#allocation4 + $0xe0] ss:$16 sps:$4 sm:$0xff]  }
  0x43   :  { %630 = vmatprep.subr.bf16.mxu0 %v2472_v13  ;;  %v2493_v27 = vld [vmem:[#allocation4 + $0x104] ss:$16 sps:$4 sm:$0xff]   ;;  %v2491_v28 = vld [vmem:[#allocation4 + $0x100] ss:$16 sps:$4 sm:$0xff]  }
  0x44   :  { %v2496_v29 = vld [vmem:[#allocation4 + $0x124] ss:$16 sps:$4 sm:$0xff]   ;;  %v2494_v30 = vld [vmem:[#allocation4 + $0x120] ss:$16 sps:$4 sm:$0xff]  }
  0x45   :  { %v2499_v31 = vld [vmem:[#allocation4 + $0x144] ss:$16 sps:$4 sm:$0xff]   ;;  %v2497_v32 = vld [vmem:[#allocation4 + $0x140] ss:$16 sps:$4 sm:$0xff]  }
  0x46   :  { %631 = vmatpush1.bf16.msra.mxu0 %v2470_v14  ;;  %v2502_v33 = vld [vmem:[#allocation4 + $0x164] ss:$16 sps:$4 sm:$0xff]   ;;  %v2500_v34 = vld [vmem:[#allocation4 + $0x160] ss:$16 sps:$4 sm:$0xff]  }
  0x47   :  { %632 = vmatprep.subr.bf16.mxu0 %v2475_v15  ;;  %v2505_v35 = vld [vmem:[#allocation4 + $0x184] ss:$16 sps:$4 sm:$0xff]   ;;  %v2503_v36 = vld [vmem:[#allocation4 + $0x180] ss:$16 sps:$4 sm:$0xff]  }
  0x48   :  { %v2508_v37 = vld [vmem:[#allocation4 + $0x1a4] ss:$16 sps:$4 sm:$0xff]   ;;  %v2506_v38 = vld [vmem:[#allocation4 + $0x1a0] ss:$16 sps:$4 sm:$0xff]  }
  0x49   :  { %v2511_v39 = vld [vmem:[#allocation4 + $0x1c4] ss:$16 sps:$4 sm:$0xff]   ;;  %v2509_v40 = vld [vmem:[#allocation4 + $0x1c0] ss:$16 sps:$4 sm:$0xff]  }
  0x4a   :  { %633 = vmatpush1.bf16.msra.mxu0 %v2473_v16  ;;  %v2514_v41 = vld [vmem:[#allocation4 + $0x1e4] ss:$16 sps:$4 sm:$0xff]   ;;  %v2512_v42 = vld [vmem:[#allocation4 + $0x1e0] ss:$16 sps:$4 sm:$0xff]  }
  0x4b   :  { %634 = vmatprep.subr.bf16.mxu0 %v2478_v17  ;;  %v2563_v44 = vld [vmem:[#allocation6] ss:$24 sps:$4 sm:$0xff]   ;;  %v2565_v45 = vld [vmem:[#allocation6 + $0x4] ss:$24 sps:$4 sm:$0xff]   ;;  %v2571_v46 = vld [vmem:[#allocation6 + $0x34] ss:$24 sps:$4 sm:$0xff]  }
  0x4c   :  { %1902 = vmatprep.subr.bf16.mxu1 %v2565_v45  ;;  %v2577_v48 = vld [vmem:[#allocation6 + $0x64] ss:$24 sps:$4 sm:$0xff]   ;;  %v2575_v49 = vld [vmem:[#allocation6 + $0x60] ss:$24 sps:$4 sm:$0xff]   ;;  %v2583_v50 = vld [vmem:[#allocation6 + $0x94] ss:$24 sps:$4 sm:$0xff]  }
  0x4d   :  { %1903 = vmatpush1.bf16.msra.mxu1 %v2563_v44  ;;  %v2581_v51 = vld [vmem:[#allocation6 + $0x90] ss:$24 sps:$4 sm:$0xff]   ;;  %v2589_v52 = vld [vmem:[#allocation6 + $0xc4] ss:$24 sps:$4 sm:$0xff]   ;;  %v2587_v53 = vld [vmem:[#allocation6 + $0xc0] ss:$24 sps:$4 sm:$0xff]  }
  0x4e   :  { %635 = vmatpush1.bf16.msra.mxu0 %v2476_v18  ;;  %1904 = vmatprep.subr.bf16.mxu1 %v2571_v46  ;;  %v2595_v54 = vld [vmem:[#allocation6 + $0xf4] ss:$24 sps:$4 sm:$0xff]   ;;  %v2593_v55 = vld [vmem:[#allocation6 + $0xf0] ss:$24 sps:$4 sm:$0xff]   ;;  %v2601_v56 = vld [vmem:[#allocation6 + $0x124] ss:$24 sps:$4 sm:$0xff]  }
  0x4f   :  { %636 = vmatprep.subr.bf16.mxu0 %v2481_v19  ;;  %v2599_v57 = vld [vmem:[#allocation6 + $0x120] ss:$24 sps:$4 sm:$0xff]   ;;  %v2607_v58 = vld [vmem:[#allocation6 + $0x154] ss:$24 sps:$4 sm:$0xff]   ;;  %v2605_v59 = vld [vmem:[#allocation6 + $0x150] ss:$24 sps:$4 sm:$0xff]  }
  0x50   :  { %v2613_v60 = vld [vmem:[#allocation6 + $0x184] ss:$24 sps:$4 sm:$0xff]   ;;  %v2611_v61 = vld [vmem:[#allocation6 + $0x180] ss:$24 sps:$4 sm:$0xff]   ;;  %v2619_v62 = vld [vmem:[#allocation6 + $0x1b4] ss:$24 sps:$4 sm:$0xff]  }
  0x51   :  { %1905 = vmatpush1.bf16.msra.mxu1 %v2569_v47  ;;  %v2617_v63 = vld [vmem:[#allocation6 + $0x1b0] ss:$24 sps:$4 sm:$0xff]   ;;  %v2625_v0 = vld [vmem:[#allocation6 + $0x1e4] ss:$24 sps:$4 sm:$0xff]   ;;  %v2623_v1 = vld [vmem:[#allocation6 + $0x1e0] ss:$24 sps:$4 sm:$0xff]  }
  0x52   :  { %637 = vmatpush1.bf16.msra.mxu0 %v2479_v20  ;;  %1906 = vmatprep.subr.bf16.mxu1 %v2577_v48  ;;  %v2631_v3 = vld [vmem:[#allocation6 + $0x214] ss:$24 sps:$4 sm:$0xff]   ;;  %v2629_v4 = vld [vmem:[#allocation6 + $0x210] ss:$24 sps:$4 sm:$0xff]   ;;  %v2637_v6 = vld [vmem:[#allocation6 + $0x244] ss:$24 sps:$4 sm:$0xff]  }
  0x53   :  { %638 = vmatprep.subr.bf16.mxu0 %v2484_v21  ;;  %v2635_v7 = vld [vmem:[#allocation6 + $0x240] ss:$24 sps:$4 sm:$0xff]   ;;  %v2643_v11 = vld [vmem:[#allocation6 + $0x274] ss:$24 sps:$4 sm:$0xff]   ;;  %v2641_v13 = vld [vmem:[#allocation6 + $0x270] ss:$24 sps:$4 sm:$0xff]  }
  0x54   :  { %v204_v9 = vld [vmem:[%s3134_s4] sm:$0x3]  ;;  %v2538_v44 = vld [vmem:[#allocation4 + $0xec] ss:$16 sps:$4 sm:$0xff]   ;;  %v2536_v45 = vld [vmem:[#allocation4 + $0xe8] ss:$16 sps:$4 sm:$0xff]  }
  0x55   :  { %1907 = vmatpush1.bf16.msra.mxu1 %v2575_v49  ;;  %v209_v15 = vrot.slane %v204_v9, %v3050_v8  ;;  %v213_v18 = vrot.slane %v204_v9, %v3056_v10  ;;  %v2541_v46 = vld [vmem:[#allocation4 + $0x10c] ss:$16 sps:$4 sm:$0xff]   ;;  %v2539_v47 = vld [vmem:[#allocation4 + $0x108] ss:$16 sps:$4 sm:$0xff]  }
  0x56   :  { %639 = vmatpush1.bf16.msra.mxu0 %v2482_v22  ;;  %1908 = vmatprep.subr.bf16.mxu1 %v2583_v50  ;;  %v2544_v48 = vld [vmem:[#allocation4 + $0x12c] ss:$16 sps:$4 sm:$0xff]   ;;  %v2542_v49 = vld [vmem:[#allocation4 + $0x128] ss:$16 sps:$4 sm:$0xff]  }
  0x57   :  { %640 = vmatprep.subr.bf16.mxu0 %v2487_v23  ;;  %v2547_v50 = vld [vmem:[#allocation4 + $0x14c] ss:$16 sps:$4 sm:$0xff]   ;;  %v2590_v9 = vld [vmem:[#allocation6 + $0xc8] ss:$24 sps:$4 sm:$0xff]  }
  0x58   :  { %v2580_v2 = vld [vmem:[#allocation6 + $0x6c] ss:$24 sps:$4 sm:$0xff]  }
  0x59   :  { %1909 = vmatpush1.bf16.msra.mxu1 %v2581_v51  ;;  %v2545_v51 = vld [vmem:[#allocation4 + $0x148] ss:$16 sps:$4 sm:$0xff]  }
  0x5a   :  { %641 = vmatpush1.bf16.msra.mxu0 %v2485_v24  ;;  %1910 = vmatprep.subr.bf16.mxu1 %v2589_v52  ;;  %v2550_v52 = vld [vmem:[#allocation4 + $0x16c] ss:$16 sps:$4 sm:$0xff]  }
  0x5b   :  { %642 = vmatprep.subr.bf16.mxu0 %v2490_v25 }
  0x5d   :  { %1911 = vmatpush1.bf16.msra.mxu1 %v2587_v53  ;;  %v2548_v53 = vld [vmem:[#allocation4 + $0x168] ss:$16 sps:$4 sm:$0xff]  }
  0x5e   :  { %643 = vmatpush1.bf16.msra.mxu0 %v2488_v26  ;;  %1912 = vmatprep.subr.bf16.mxu1 %v2595_v54  ;;  %v2553_v54 = vld [vmem:[#allocation4 + $0x18c] ss:$16 sps:$4 sm:$0xff]  }
  0x5f   :  { %644 = vmatprep.subr.bf16.mxu0 %v2493_v27 }
  0x61   :  { %1913 = vmatpush1.bf16.msra.mxu1 %v2593_v55  ;;  %v2551_v55 = vld [vmem:[#allocation4 + $0x188] ss:$16 sps:$4 sm:$0xff]  }
  0x62   :  { %645 = vmatpush1.bf16.msra.mxu0 %v2491_v28  ;;  %1914 = vmatprep.subr.bf16.mxu1 %v2601_v56  ;;  %v2556_v56 = vld [vmem:[#allocation4 + $0x1ac] ss:$16 sps:$4 sm:$0xff]  }
  0x63   :  { %646 = vmatprep.subr.bf16.mxu0 %v2496_v29 }
  0x65   :  { %1915 = vmatpush1.bf16.msra.mxu1 %v2599_v57  ;;  %v2554_v57 = vld [vmem:[#allocation4 + $0x1a8] ss:$16 sps:$4 sm:$0xff]  }
  0x66   :  { %647 = vmatpush1.bf16.msra.mxu0 %v2494_v30  ;;  %1916 = vmatprep.subr.bf16.mxu1 %v2607_v58  ;;  %v2515_v30 = vld [vmem:[#allocation4 + $0x8] ss:$16 sps:$4 sm:$0xff]   ;;  %v2559_v58 = vld [vmem:[#allocation4 + $0x1cc] ss:$16 sps:$4 sm:$0xff]  }
  0x67   :  { %648 = vmatprep.subr.bf16.mxu0 %v2499_v31 }
  0x69   :  { %1917 = vmatpush1.bf16.msra.mxu1 %v2605_v59  ;;  %v2557_v59 = vld [vmem:[#allocation4 + $0x1c8] ss:$16 sps:$4 sm:$0xff]  }
  0x6a   :  { %649 = vmatpush1.bf16.msra.mxu0 %v2497_v32  ;;  %1918 = vmatprep.subr.bf16.mxu1 %v2613_v60  ;;  %v2520_v32 = vld [vmem:[#allocation4 + $0x2c] ss:$16 sps:$4 sm:$0xff]  }
  0x6b   :  { %650 = vmatprep.subr.bf16.mxu0 %v2502_v33  ;;  %v2518_v33 = vld [vmem:[#allocation4 + $0x28] ss:$16 sps:$4 sm:$0xff]   ;;  %v2562_v60 = vld [vmem:[#allocation4 + $0x1ec] ss:$16 sps:$4 sm:$0xff]  }
  0x6d   :  { %1919 = vmatpush1.bf16.msra.mxu1 %v2611_v61  ;;  %v2560_v61 = vld [vmem:[#allocation4 + $0x1e8] ss:$16 sps:$4 sm:$0xff]  }
  0x6e   :  { %651 = vmatpush1.bf16.msra.mxu0 %v2500_v34  ;;  %1920 = vmatprep.subr.bf16.mxu1 %v2619_v62  ;;  %v2523_v34 = vld [vmem:[#allocation4 + $0x4c] ss:$16 sps:$4 sm:$0xff]  }
  0x6f   :  { %652 = vmatprep.subr.bf16.mxu0 %v2505_v35  ;;  %v2521_v35 = vld [vmem:[#allocation4 + $0x48] ss:$16 sps:$4 sm:$0xff]   ;;  %v2568_v62 = vld [vmem:[#allocation6 + $0xc] ss:$24 sps:$4 sm:$0xff]  }
  0x71   :  { %1921 = vmatpush1.bf16.msra.mxu1 %v2617_v63  ;;  %v2566_v63 = vld [vmem:[#allocation6 + $0x8] ss:$24 sps:$4 sm:$0xff]  }
  0x72   :  { %653 = vmatpush1.bf16.msra.mxu0 %v2503_v36  ;;  %1922 = vmatprep.subr.bf16.mxu1 %v2625_v0  ;;  %v2526_v36 = vld [vmem:[#allocation4 + $0x6c] ss:$16 sps:$4 sm:$0xff]  }
  0x73   :  { %654 = vmatprep.subr.bf16.mxu0 %v2508_v37  ;;  %v2524_v37 = vld [vmem:[#allocation4 + $0x68] ss:$16 sps:$4 sm:$0xff]   ;;  %v2574_v0 = vld [vmem:[#allocation6 + $0x3c] ss:$24 sps:$4 sm:$0xff]  }
  0x75   :  { %1923 = vmatpush1.bf16.msra.mxu1 %v2623_v1  ;;  %v2572_v1 = vld [vmem:[#allocation6 + $0x38] ss:$24 sps:$4 sm:$0xff]  }
  0x76   :  { %655 = vmatpush1.bf16.msra.mxu0 %v2506_v38  ;;  %1924 = vmatprep.subr.bf16.mxu1 %v2631_v3  ;;  %v2529_v38 = vld [vmem:[#allocation4 + $0x8c] ss:$16 sps:$4 sm:$0xff]   ;;  %v2578_v3 = vld [vmem:[#allocation6 + $0x68] ss:$24 sps:$4 sm:$0xff]  }
  0x77   :  { %656 = vmatprep.subr.bf16.mxu0 %v2511_v39  ;;  %v2527_v39 = vld [vmem:[#allocation4 + $0x88] ss:$16 sps:$4 sm:$0xff]  }
  0x79   :  { %1925 = vmatpush1.bf16.msra.mxu1 %v2629_v4  ;;  %v2586_v4 = vld [vmem:[#allocation6 + $0x9c] ss:$24 sps:$4 sm:$0xff]  }
  0x7a   :  { %657 = vmatpush1.bf16.msra.mxu0 %v2509_v40  ;;  %1926 = vmatprep.subr.bf16.mxu1 %v2637_v6  ;;  %v2532_v40 = vld [vmem:[#allocation4 + $0xac] ss:$16 sps:$4 sm:$0xff]   ;;  %v2584_v6 = vld [vmem:[#allocation6 + $0x98] ss:$24 sps:$4 sm:$0xff]  }
  0x7b   :  { %658 = vmatprep.subr.bf16.mxu0 %v2514_v41  ;;  %v2530_v41 = vld [vmem:[#allocation4 + $0xa8] ss:$16 sps:$4 sm:$0xff]  }
  0x7d   :  { %1927 = vmatpush1.bf16.msra.mxu1 %v2635_v7  ;;  %v2592_v7 = vld [vmem:[#allocation6 + $0xcc] ss:$24 sps:$4 sm:$0xff]  }
  0x7e   :  { %659 = vmatpush1.bf16.msra.mxu0 %v2512_v42  ;;  %1928 = vmatprep.subr.bf16.mxu1 %v2643_v11  ;;  %v2535_v42 = vld [vmem:[#allocation4 + $0xcc] ss:$16 sps:$4 sm:$0xff]  }
  0x7f   :  { %669 = vmatprep.subr.bf16.mxu0 %v2517_v43  ;;  %v2533_v43 = vld [vmem:[#allocation4 + $0xc8] ss:$16 sps:$4 sm:$0xff]   ;;  %v2598_v11 = vld [vmem:[#allocation6 + $0xfc] ss:$24 sps:$4 sm:$0xff]  }
  0x81   :  { %1929 = vmatpush1.bf16.msra.mxu1 %v2641_v13  ;;  %v2604_v13 = vld [vmem:[#allocation6 + $0x12c] ss:$24 sps:$4 sm:$0xff]  }
 0x110   :  { %v197_v12 = vpop.f32.mrb[0].mxu1 }
 0x111   :  { %v199_v14 = vpop.f32.mrb[1].mxu1 }
 0x112   :  { %v201_v16 = vpop.f32.mrb[2].mxu1 }
 0x113   :  { %v202_v20 = vpop.f32.mrb[3].mxu1  ;;  %v2602_v16 = vld [vmem:[#allocation6 + $0x128] ss:$24 sps:$4 sm:$0xff]  }
 0x114   :  { %v142_v17 = vpop.f32.mrb[0].mxu0  ;;  %v2608_v20 = vld [vmem:[#allocation6 + $0x158] ss:$24 sps:$4 sm:$0xff]  }
 0x115   :  { %v198_v19 = vadd.f32 %v197_v12, %v142_v17  ;;  %v144_v21 = vpop.f32.mrb[1].mxu0  ;;  %v2596_v12 = vld [vmem:[#allocation6 + $0xf8] ss:$24 sps:$4 sm:$0xff]   ;;  %v2610_v17 = vld [vmem:[#allocation6 + $0x15c] ss:$24 sps:$4 sm:$0xff]  }
 0x116   :  { %v200_v22 = vadd.f32 %v199_v14, %v144_v21  ;;  %v146_v23 = vpop.f32.mrb[2].mxu0  ;;  %v2649_v14 = vld [vmem:[#allocation6 + $0x2a4] ss:$24 sps:$4 sm:$0xff]  }
 0x117   :  { %v216_v24 = vadd.f32 %v209_v15, %v198_v19  ;;  %v147_v25 = vpop.f32.mrb[3].mxu0  ;;  %v2647_v15 = vld [vmem:[#allocation6 + $0x2a0] ss:$24 sps:$4 sm:$0xff]   ;;  %1930 = vmatprep.subr.bf16.mxu1 %v2649_v14  ;;  %v2653_v19 = vld [vmem:[#allocation6 + $0x2d0] ss:$24 sps:$4 sm:$0xff]  }
 0x118   :  { %v217_v26 = vadd.f32 %v213_v18, %v200_v22  ;;  %1931 = vmatpush1.bf16.msra.mxu1 %v2647_v15  ;;  %v2655_v18 = vld [vmem:[#allocation6 + $0x2d4] ss:$24 sps:$4 sm:$0xff]   ;;  %v2661_v22 = vld [vmem:[#allocation6 + $0x304] ss:$24 sps:$4 sm:$0xff]   ;;  %v2614_v23 = vld [vmem:[#allocation6 + $0x188] ss:$24 sps:$4 sm:$0xff]  }
 0x119   :  { %v218_v27 = vmax.f32 %v216_v24, 0.0  ;;  %1932 = vmatprep.subr.bf16.mxu1 %v2655_v18  ;;  %v2616_v21 = vld [vmem:[#allocation6 + $0x18c] ss:$24 sps:$4 sm:$0xff]   ;;  %v2622_v24 = vld [vmem:[#allocation6 + $0x1bc] ss:$24 sps:$4 sm:$0xff]  }
 0x11a   :  { %v219_v28 = vmax.f32 %v217_v26, 0.0  ;;  %v2620_v25 = vld [vmem:[#allocation6 + $0x1b8] ss:$24 sps:$4 sm:$0xff]   ;;  %v2628_v26 = vld [vmem:[#allocation6 + $0x1ec] ss:$24 sps:$4 sm:$0xff]  }
 0x11b   :  { %v3060_v31 = vpack.c.bf16 %v218_v27, %v218_v27  ;;  %v2626_v27 = vld [vmem:[#allocation6 + $0x1e8] ss:$24 sps:$4 sm:$0xff]   ;;  %v2700_v14 = vld [vmem:[#allocation6 + $0x42c] ss:$24 sps:$4 sm:$0xff]   ;;  %v2706_v18 = vld [vmem:[#allocation6 + $0x45c] ss:$24 sps:$4 sm:$0xff]  }
 0x11c   :  { %v221_v29 = vpack.c.bf16 %v219_v28, %v219_v28  ;;  %1933 = vmatpush1.bf16.msra.mxu1 %v2653_v19  ;;  %v2634_v28 = vld [vmem:[#allocation6 + $0x21c] ss:$24 sps:$4 sm:$0xff]   ;;  %v2695_v15 = vld [vmem:[#allocation6 + $0x420] ss:$24 sps:$4 sm:$0xff]   ;;  %v2701_v19 = vld [vmem:[#allocation6 + $0x450] ss:$24 sps:$4 sm:$0xff]  }
 0x11d   :  { %1943 = vmatprep.subr.bf16.mxu1 %v2661_v22  ;;  %v2712_v22 = vld [vmem:[#allocation6 + $0x48c] ss:$24 sps:$4 sm:$0xff]  }
 0x11e   :  { %660 = vmatprep.mubr.bf16.mxu0 %v221_v29 }
 0x11f   :  { %661 = vmatmul.mubr.bf16.vlgmr.msra.gmra.mrb[4].mxu0 %v3060_v31 }
 0x120   :  { %670 = vmatpush1.bf16.msra.mxu0 %v2515_v30  ;;  %701 = vmatprep.mubr.bf16.mxu0 %v221_v29  ;;  %v2632_v29 = vld [vmem:[#allocation6 + $0x218] ss:$24 sps:$4 sm:$0xff]   ;;  %v2640_v30 = vld [vmem:[#allocation6 + $0x24c] ss:$24 sps:$4 sm:$0xff]  }
 0x121   :  { %671 = vmatprep.subr.bf16.mxu0 %v2520_v32  ;;  %v2646_v32 = vld [vmem:[#allocation6 + $0x27c] ss:$24 sps:$4 sm:$0xff]  }
 0x124   :  { %672 = vmatpush1.bf16.msra.mxu0 %v2518_v33  ;;  %v2644_v33 = vld [vmem:[#allocation6 + $0x278] ss:$24 sps:$4 sm:$0xff]  }
 0x125   :  { %673 = vmatprep.subr.bf16.mxu0 %v2523_v34  ;;  %v2652_v34 = vld [vmem:[#allocation6 + $0x2ac] ss:$24 sps:$4 sm:$0xff]  }
 0x128   :  { %674 = vmatpush1.bf16.msra.mxu0 %v2521_v35  ;;  %v2650_v35 = vld [vmem:[#allocation6 + $0x2a8] ss:$24 sps:$4 sm:$0xff]  }
 0x129   :  { %675 = vmatprep.subr.bf16.mxu0 %v2526_v36  ;;  %v2658_v36 = vld [vmem:[#allocation6 + $0x2dc] ss:$24 sps:$4 sm:$0xff]  }
 0x12c   :  { %676 = vmatpush1.bf16.msra.mxu0 %v2524_v37  ;;  %v2656_v37 = vld [vmem:[#allocation6 + $0x2d8] ss:$24 sps:$4 sm:$0xff]  }
 0x12d   :  { %677 = vmatprep.subr.bf16.mxu0 %v2529_v38  ;;  %v2664_v38 = vld [vmem:[#allocation6 + $0x30c] ss:$24 sps:$4 sm:$0xff]  }
 0x130   :  { %678 = vmatpush1.bf16.msra.mxu0 %v2527_v39  ;;  %v3067_v39 = vld [vmem:[%s3136_s6] sm:$0xf] }
 0x131   :  { %679 = vmatprep.subr.bf16.mxu0 %v2532_v40  ;;  %v291_v40 = vrot.slane %v3067_v39, %v3050_v8 }
 0x134   :  { %680 = vmatpush1.bf16.msra.mxu0 %v2530_v41  ;;  %v295_v41 = vrot.slane %v3067_v39, %v3056_v10 }
 0x135   :  { %681 = vmatprep.subr.bf16.mxu0 %v2535_v42 }
 0x138   :  { %682 = vmatpush1.bf16.msra.mxu0 %v2533_v43 }
 0x139   :  { %683 = vmatprep.subr.bf16.mxu0 %v2538_v44 }
 0x13c   :  { %684 = vmatpush1.bf16.msra.mxu0 %v2536_v45 }
 0x13d   :  { %685 = vmatprep.subr.bf16.mxu0 %v2541_v46 }
 0x140   :  { %686 = vmatpush1.bf16.msra.mxu0 %v2539_v47 }
 0x141   :  { %687 = vmatprep.subr.bf16.mxu0 %v2544_v48 }
 0x144   :  { %688 = vmatpush1.bf16.msra.mxu0 %v2542_v49 }
 0x145   :  { %689 = vmatprep.subr.bf16.mxu0 %v2547_v50 }
 0x148   :  { %690 = vmatpush1.bf16.msra.mxu0 %v2545_v51  ;;  %v2659_v51 = vld [vmem:[#allocation6 + $0x300] ss:$24 sps:$4 sm:$0xff]  }
 0x149   :  { %691 = vmatprep.subr.bf16.mxu0 %v2550_v52  ;;  %v2662_v52 = vld [vmem:[#allocation6 + $0x308] ss:$24 sps:$4 sm:$0xff]  }
 0x14c   :  { %692 = vmatpush1.bf16.msra.mxu0 %v2548_v53 }
 0x14d   :  { %693 = vmatprep.subr.bf16.mxu0 %v2553_v54  ;;  %v2667_v54 = vld [vmem:[#allocation6 + $0x334] ss:$24 sps:$4 sm:$0xff]  }
 0x150   :  { %694 = vmatpush1.bf16.msra.mxu0 %v2551_v55  ;;  %v2670_v55 = vld [vmem:[#allocation6 + $0x33c] ss:$24 sps:$4 sm:$0xff]  }
 0x151   :  { %695 = vmatprep.subr.bf16.mxu0 %v2556_v56  ;;  %v2665_v56 = vld [vmem:[#allocation6 + $0x330] ss:$24 sps:$4 sm:$0xff]  }
 0x154   :  { %696 = vmatpush1.bf16.msra.mxu0 %v2554_v57  ;;  %v2668_v57 = vld [vmem:[#allocation6 + $0x338] ss:$24 sps:$4 sm:$0xff]  }
 0x155   :  { %697 = vmatprep.subr.bf16.mxu0 %v2559_v58  ;;  %v2673_v58 = vld [vmem:[#allocation6 + $0x364] ss:$24 sps:$4 sm:$0xff]  }
 0x158   :  { %698 = vmatpush1.bf16.msra.mxu0 %v2557_v59  ;;  %v2676_v59 = vld [vmem:[#allocation6 + $0x36c] ss:$24 sps:$4 sm:$0xff]  }
 0x159   :  { %699 = vmatprep.subr.bf16.mxu0 %v2562_v60  ;;  %v2671_v60 = vld [vmem:[#allocation6 + $0x360] ss:$24 sps:$4 sm:$0xff]  }
 0x15c   :  { %700 = vmatpush1.bf16.msra.mxu0 %v2560_v61  ;;  %v2674_v61 = vld [vmem:[#allocation6 + $0x368] ss:$24 sps:$4 sm:$0xff]  }
 0x15d   :  { %1984 = vmatprep.subr.bf16.mxu0 %v2568_v62  ;;  %v2679_v62 = vld [vmem:[#allocation6 + $0x394] ss:$24 sps:$4 sm:$0xff]  }
 0x15f   :  { %702 = vmatmul.mubr.bf16.vlgmr.msra.gmra.mrb[8].mxu0 %v3060_v31  ;;  %v2638_v31 = vld [vmem:[#allocation6 + $0x248] ss:$24 sps:$4 sm:$0xff]  }
 0x160   :  { %1985 = vmatpush1.bf16.msra.mxu0 %v2566_v63  ;;  %v2682_v63 = vld [vmem:[#allocation6 + $0x39c] ss:$24 sps:$4 sm:$0xff]  }
 0x161   :  { %1986 = vmatprep.subr.bf16.mxu0 %v2574_v0  ;;  %v2677_v0 = vld [vmem:[#allocation6 + $0x390] ss:$24 sps:$4 sm:$0xff]  }
 0x164   :  { %1987 = vmatpush1.bf16.msra.mxu0 %v2572_v1  ;;  %v2680_v1 = vld [vmem:[#allocation6 + $0x398] ss:$24 sps:$4 sm:$0xff]  }
 0x165   :  { %1988 = vmatprep.subr.bf16.mxu0 %v2580_v2  ;;  %v2685_v2 = vld [vmem:[#allocation6 + $0x3c4] ss:$24 sps:$4 sm:$0xff]  }
 0x168   :  { %1989 = vmatpush1.bf16.msra.mxu0 %v2578_v3  ;;  %v2688_v3 = vld [vmem:[#allocation6 + $0x3cc] ss:$24 sps:$4 sm:$0xff]  }
 0x169   :  { %1990 = vmatprep.subr.bf16.mxu0 %v2586_v4  ;;  %v2683_v4 = vld [vmem:[#allocation6 + $0x3c0] ss:$24 sps:$4 sm:$0xff]  }
 0x16c   :  { %1991 = vmatpush1.bf16.msra.mxu0 %v2584_v6  ;;  %v2686_v6 = vld [vmem:[#allocation6 + $0x3c8] ss:$24 sps:$4 sm:$0xff]  }
 0x16d   :  { %1992 = vmatprep.subr.bf16.mxu0 %v2592_v7  ;;  %v2691_v7 = vld [vmem:[#allocation6 + $0x3f4] ss:$24 sps:$4 sm:$0xff]  }
 0x170   :  { %1993 = vmatpush1.bf16.msra.mxu0 %v2590_v9  ;;  %v2694_v9 = vld [vmem:[#allocation6 + $0x3fc] ss:$24 sps:$4 sm:$0xff]  }
 0x171   :  { %1994 = vmatprep.subr.bf16.mxu0 %v2598_v11  ;;  %v2689_v11 = vld [vmem:[#allocation6 + $0x3f0] ss:$24 sps:$4 sm:$0xff]  }
 0x174   :  { %1995 = vmatpush1.bf16.msra.mxu0 %v2596_v12  ;;  %v2692_v12 = vld [vmem:[#allocation6 + $0x3f8] ss:$24 sps:$4 sm:$0xff]  }
 0x175   :  { %1996 = vmatprep.subr.bf16.mxu0 %v2604_v13  ;;  %v2697_v13 = vld [vmem:[#allocation6 + $0x424] ss:$24 sps:$4 sm:$0xff]  }
 0x178   :  { %1997 = vmatpush1.bf16.msra.mxu0 %v2602_v16  ;;  %v2698_v16 = vld [vmem:[#allocation6 + $0x428] ss:$24 sps:$4 sm:$0xff]  }
 0x179   :  { %1998 = vmatprep.subr.bf16.mxu0 %v2610_v17  ;;  %v2703_v17 = vld [vmem:[#allocation6 + $0x454] ss:$24 sps:$4 sm:$0xff]  }
 0x17c   :  { %1999 = vmatpush1.bf16.msra.mxu0 %v2608_v20  ;;  %v2704_v20 = vld [vmem:[#allocation6 + $0x458] ss:$24 sps:$4 sm:$0xff]  }
 0x17d   :  { %2000 = vmatprep.subr.bf16.mxu0 %v2616_v21  ;;  %v2709_v21 = vld [vmem:[#allocation6 + $0x484] ss:$24 sps:$4 sm:$0xff]  }
 0x180   :  { %2001 = vmatpush1.bf16.msra.mxu0 %v2614_v23  ;;  %v2707_v23 = vld [vmem:[#allocation6 + $0x480] ss:$24 sps:$4 sm:$0xff]  }
 0x181   :  { %2002 = vmatprep.subr.bf16.mxu0 %v2622_v24  ;;  %v2710_v24 = vld [vmem:[#allocation6 + $0x488] ss:$24 sps:$4 sm:$0xff]  }
 0x184   :  { %2003 = vmatpush1.bf16.msra.mxu0 %v2620_v25  ;;  %v2715_v25 = vld [vmem:[#allocation6 + $0x4b4] ss:$24 sps:$4 sm:$0xff]  }
 0x185   :  { %2004 = vmatprep.subr.bf16.mxu0 %v2628_v26  ;;  %v2718_v26 = vld [vmem:[#allocation6 + $0x4bc] ss:$24 sps:$4 sm:$0xff]  }
 0x188   :  { %2005 = vmatpush1.bf16.msra.mxu0 %v2626_v27  ;;  %v2713_v27 = vld [vmem:[#allocation6 + $0x4b0] ss:$24 sps:$4 sm:$0xff]  }
 0x189   :  { %2006 = vmatprep.subr.bf16.mxu0 %v2634_v28  ;;  %v2716_v28 = vld [vmem:[#allocation6 + $0x4b8] ss:$24 sps:$4 sm:$0xff]  }
 0x18c   :  { %2007 = vmatpush1.bf16.msra.mxu0 %v2632_v29  ;;  %v2721_v29 = vld [vmem:[#allocation6 + $0x4e4] ss:$24 sps:$4 sm:$0xff]  }
 0x18d   :  { %2008 = vmatprep.subr.bf16.mxu0 %v2640_v30  ;;  %v2724_v30 = vld [vmem:[#allocation6 + $0x4ec] ss:$24 sps:$4 sm:$0xff]  }
 0x190   :  { %2009 = vmatpush1.bf16.msra.mxu0 %v2638_v31  ;;  %v2719_v31 = vld [vmem:[#allocation6 + $0x4e0] ss:$24 sps:$4 sm:$0xff]  }
 0x191   :  { %2010 = vmatprep.subr.bf16.mxu0 %v2646_v32  ;;  %v2722_v32 = vld [vmem:[#allocation6 + $0x4e8] ss:$24 sps:$4 sm:$0xff]  }
 0x194   :  { %2011 = vmatpush1.bf16.msra.mxu0 %v2644_v33  ;;  %v2727_v33 = vld [vmem:[#allocation6 + $0x514] ss:$24 sps:$4 sm:$0xff]  }
 0x195   :  { %2012 = vmatprep.subr.bf16.mxu0 %v2652_v34  ;;  %v2730_v34 = vld [vmem:[#allocation6 + $0x51c] ss:$24 sps:$4 sm:$0xff]  }
 0x198   :  { %2013 = vmatpush1.bf16.msra.mxu0 %v2650_v35  ;;  %v2725_v35 = vld [vmem:[#allocation6 + $0x510] ss:$24 sps:$4 sm:$0xff]  }
 0x199   :  { %2014 = vmatprep.subr.bf16.mxu0 %v2658_v36  ;;  %v2728_v36 = vld [vmem:[#allocation6 + $0x518] ss:$24 sps:$4 sm:$0xff]  }
 0x19c   :  { %2015 = vmatpush1.bf16.msra.mxu0 %v2656_v37  ;;  %v2733_v37 = vld [vmem:[#allocation6 + $0x544] ss:$24 sps:$4 sm:$0xff]  }
 0x19d   :  { %2025 = vmatprep.subr.bf16.mxu0 %v2664_v38  ;;  %v2736_v38 = vld [vmem:[#allocation6 + $0x54c] ss:$24 sps:$4 sm:$0xff]  }
 0x1f2   :  { %v662_v42 = vpop.f32.mrb[4].mxu0 }
 0x1f3   :  { %v663_v43 = vadd.f32 %v662_v42, %v291_v40  ;;  %v664_v44 = vpop.f32.mrb[5].mxu0  ;;  %v2731_v40 = vld [vmem:[#allocation6 + $0x540] ss:$24 sps:$4 sm:$0xff]   ;;  %v2739_v42 = vld [vmem:[#allocation6 + $0x574] ss:$24 sps:$4 sm:$0xff]  }
 0x1f4   :  { %v665_v45 = vadd.f32 %v664_v44, %v295_v41  ;;  %v666_v46 = vpop.f32.mrb[6].mxu0  ;;  %v2734_v41 = vld [vmem:[#allocation6 + $0x548] ss:$24 sps:$4 sm:$0xff]   ;;  %v298_v44 = vsub.s32 2, %v3047_v5 }
 0x1f5   :  { %v710_v47 = vmax.f32 %v663_v43, 0.0  ;;  %v667_v48 = vpop.f32.mrb[7].mxu0  ;;  %v2742_v43 = vld [vmem:[#allocation6 + $0x57c] ss:$24 sps:$4 sm:$0xff]   ;;  %v2740_v46 = vld [vmem:[#allocation6 + $0x578] ss:$24 sps:$4 sm:$0xff]  }
 0x1f6   :  { %v711_v49 = vmax.f32 %v665_v45, 0.0  ;;  %v2737_v45 = vld [vmem:[#allocation6 + $0x570] ss:$24 sps:$4 sm:$0xff]   ;;  %v2745_v48 = vld [vmem:[#allocation6 + $0x5a4] ss:$24 sps:$4 sm:$0xff]  }
 0x1f7   :  { %v3075_v53 = vpack.c.bf16 %v710_v47, %v710_v47  ;;  %v302_v47 = vsub.s32 3, %v3047_v5 }
 0x1f8   :  { %v3073_v50 = vpack.c.bf16 %v711_v49, %v711_v49  ;;  %v2748_v49 = vld [vmem:[#allocation6 + $0x5ac] ss:$24 sps:$4 sm:$0xff]  }
 0x1fa   :  { %1934 = vmatprep.mubr.bf16.mxu1 %v3073_v50  ;;  %2016 = vmatprep.mubr.bf16.mxu0 %v3073_v50 }
 0x1fb   :  { %1935 = vmatmul.mubr.bf16.vlgmr.msra.gmra.mrb[4].mxu1 %v3075_v53  ;;  %2017 = vmatmul.mubr.bf16.vlgmr.msra.gmra.mrb[12].mxu0 %v3075_v53 }
 0x1fc   :  { %1944 = vmatpush1.bf16.msra.mxu1 %v2659_v51  ;;  %2026 = vmatpush1.bf16.msra.mxu0 %v2662_v52  ;;  %v299_v51 = vrot.slane %v3067_v39, %v298_v44  ;;  %v303_v52 = vrot.slane %v3067_v39, %v302_v47  ;;  %v2757_v39 = vld [vmem:[#allocation6 + $0x14] ss:$24 sps:$4 sm:$0xff]  }
 0x1fd   :  { %1945 = vmatprep.subr.bf16.mxu1 %v2667_v54  ;;  %2027 = vmatprep.subr.bf16.mxu0 %v2670_v55  ;;  %v2743_v54 = vld [vmem:[#allocation6 + $0x5a0] ss:$24 sps:$4 sm:$0xff]  }
 0x1fe   :  { %v2746_v55 = vld [vmem:[#allocation6 + $0x5a8] ss:$24 sps:$4 sm:$0xff]  }
 0x200   :  { %1946 = vmatpush1.bf16.msra.mxu1 %v2665_v56  ;;  %2028 = vmatpush1.bf16.msra.mxu0 %v2668_v57  ;;  %v2751_v56 = vld [vmem:[#allocation6 + $0x5d4] ss:$24 sps:$4 sm:$0xff]  }
 0x201   :  { %1947 = vmatprep.subr.bf16.mxu1 %v2673_v58  ;;  %2029 = vmatprep.subr.bf16.mxu0 %v2676_v59  ;;  %v2754_v57 = vld [vmem:[#allocation6 + $0x5dc] ss:$24 sps:$4 sm:$0xff]  }
 0x204   :  { %1948 = vmatpush1.bf16.msra.mxu1 %v2671_v60  ;;  %2030 = vmatpush1.bf16.msra.mxu0 %v2674_v61 }
 0x205   :  { %1949 = vmatprep.subr.bf16.mxu1 %v2679_v62  ;;  %2031 = vmatprep.subr.bf16.mxu0 %v2682_v63  ;;  %v2749_v63 = vld [vmem:[#allocation6 + $0x5d0] ss:$24 sps:$4 sm:$0xff]  }
 0x208   :  { %1950 = vmatpush1.bf16.msra.mxu1 %v2677_v0  ;;  %2032 = vmatpush1.bf16.msra.mxu0 %v2680_v1  ;;  %v2752_v0 = vld [vmem:[#allocation6 + $0x5d8] ss:$24 sps:$4 sm:$0xff]  }
 0x209   :  { %1951 = vmatprep.subr.bf16.mxu1 %v2685_v2  ;;  %2033 = vmatprep.subr.bf16.mxu0 %v2688_v3 }
 0x20c   :  { %1952 = vmatpush1.bf16.msra.mxu1 %v2683_v4  ;;  %2034 = vmatpush1.bf16.msra.mxu0 %v2686_v6  ;;  %v2755_v6 = vld [vmem:[#allocation6 + $0x10] ss:$24 sps:$4 sm:$0xff]  }
 0x20d   :  { %1953 = vmatprep.subr.bf16.mxu1 %v2691_v7  ;;  %2035 = vmatprep.subr.bf16.mxu0 %v2694_v9  ;;  %v2760_v9 = vld [vmem:[#allocation6 + $0x44] ss:$24 sps:$4 sm:$0xff]  }
 0x210   :  { %1954 = vmatpush1.bf16.msra.mxu1 %v2689_v11  ;;  %2036 = vmatpush1.bf16.msra.mxu0 %v2692_v12  ;;  %v2758_v11 = vld [vmem:[#allocation6 + $0x40] ss:$24 sps:$4 sm:$0xff]   ;;  %v2763_v12 = vld [vmem:[#allocation6 + $0x74] ss:$24 sps:$4 sm:$0xff]  }
 0x211   :  { %1955 = vmatprep.subr.bf16.mxu1 %v2697_v13  ;;  %2037 = vmatprep.subr.bf16.mxu0 %v2700_v14  ;;  %v2761_v13 = vld [vmem:[#allocation6 + $0x70] ss:$24 sps:$4 sm:$0xff]   ;;  %v2766_v14 = vld [vmem:[#allocation6 + $0xa4] ss:$24 sps:$4 sm:$0xff]  }
 0x214   :  { %1956 = vmatpush1.bf16.msra.mxu1 %v2695_v15  ;;  %2038 = vmatpush1.bf16.msra.mxu0 %v2698_v16  ;;  %v2764_v15 = vld [vmem:[#allocation6 + $0xa0] ss:$24 sps:$4 sm:$0xff]   ;;  %v2769_v16 = vld [vmem:[#allocation6 + $0xd4] ss:$24 sps:$4 sm:$0xff]  }
 0x215   :  { %1957 = vmatprep.subr.bf16.mxu1 %v2703_v17  ;;  %2039 = vmatprep.subr.bf16.mxu0 %v2706_v18  ;;  %v2767_v17 = vld [vmem:[#allocation6 + $0xd0] ss:$24 sps:$4 sm:$0xff]   ;;  %v2772_v18 = vld [vmem:[#allocation6 + $0x104] ss:$24 sps:$4 sm:$0xff]  }
 0x218   :  { %1958 = vmatpush1.bf16.msra.mxu1 %v2701_v19  ;;  %2040 = vmatpush1.bf16.msra.mxu0 %v2704_v20  ;;  %v2770_v19 = vld [vmem:[#allocation6 + $0x100] ss:$24 sps:$4 sm:$0xff]   ;;  %v2775_v20 = vld [vmem:[#allocation6 + $0x134] ss:$24 sps:$4 sm:$0xff]  }
 0x219   :  { %1959 = vmatprep.subr.bf16.mxu1 %v2709_v21  ;;  %2041 = vmatprep.subr.bf16.mxu0 %v2712_v22  ;;  %v2778_v21 = vld [vmem:[#allocation6 + $0x164] ss:$24 sps:$4 sm:$0xff]   ;;  %v2776_v22 = vld [vmem:[#allocation6 + $0x160] ss:$24 sps:$4 sm:$0xff]  }
 0x21c   :  { %1960 = vmatpush1.bf16.msra.mxu1 %v2707_v23  ;;  %2042 = vmatpush1.bf16.msra.mxu0 %v2710_v24  ;;  %v2781_v23 = vld [vmem:[#allocation6 + $0x194] ss:$24 sps:$4 sm:$0xff]   ;;  %v2779_v24 = vld [vmem:[#allocation6 + $0x190] ss:$24 sps:$4 sm:$0xff]  }
 0x21d   :  { %1961 = vmatprep.subr.bf16.mxu1 %v2715_v25  ;;  %2043 = vmatprep.subr.bf16.mxu0 %v2718_v26  ;;  %v2784_v25 = vld [vmem:[#allocation6 + $0x1c4] ss:$24 sps:$4 sm:$0xff]   ;;  %v2782_v26 = vld [vmem:[#allocation6 + $0x1c0] ss:$24 sps:$4 sm:$0xff]  }
 0x220   :  { %1962 = vmatpush1.bf16.msra.mxu1 %v2713_v27  ;;  %2044 = vmatpush1.bf16.msra.mxu0 %v2716_v28  ;;  %v2787_v27 = vld [vmem:[#allocation6 + $0x1f4] ss:$24 sps:$4 sm:$0xff]   ;;  %v2785_v28 = vld [vmem:[#allocation6 + $0x1f0] ss:$24 sps:$4 sm:$0xff]  }
 0x221   :  { %1963 = vmatprep.subr.bf16.mxu1 %v2721_v29  ;;  %2045 = vmatprep.subr.bf16.mxu0 %v2724_v30  ;;  %v2790_v29 = vld [vmem:[#allocation6 + $0x224] ss:$24 sps:$4 sm:$0xff]   ;;  %v2788_v30 = vld [vmem:[#allocation6 + $0x220] ss:$24 sps:$4 sm:$0xff]  }
 0x224   :  { %1964 = vmatpush1.bf16.msra.mxu1 %v2719_v31  ;;  %2046 = vmatpush1.bf16.msra.mxu0 %v2722_v32  ;;  %v2793_v31 = vld [vmem:[#allocation6 + $0x254] ss:$24 sps:$4 sm:$0xff]   ;;  %v2791_v32 = vld [vmem:[#allocation6 + $0x250] ss:$24 sps:$4 sm:$0xff]  }
 0x225   :  { %1965 = vmatprep.subr.bf16.mxu1 %v2727_v33  ;;  %2047 = vmatprep.subr.bf16.mxu0 %v2730_v34  ;;  %v2796_v33 = vld [vmem:[#allocation6 + $0x284] ss:$24 sps:$4 sm:$0xff]   ;;  %v2794_v34 = vld [vmem:[#allocation6 + $0x280] ss:$24 sps:$4 sm:$0xff]  }
 0x228   :  { %1966 = vmatpush1.bf16.msra.mxu1 %v2725_v35  ;;  %2048 = vmatpush1.bf16.msra.mxu0 %v2728_v36  ;;  %v2799_v35 = vld [vmem:[#allocation6 + $0x2b4] ss:$24 sps:$4 sm:$0xff]   ;;  %v2797_v36 = vld [vmem:[#allocation6 + $0x2b0] ss:$24 sps:$4 sm:$0xff]  }
 0x229   :  { %1967 = vmatprep.subr.bf16.mxu1 %v2733_v37  ;;  %2049 = vmatprep.subr.bf16.mxu0 %v2736_v38  ;;  %v2802_v37 = vld [vmem:[#allocation6 + $0x2e4] ss:$24 sps:$4 sm:$0xff]   ;;  %v2800_v38 = vld [vmem:[#allocation6 + $0x2e0] ss:$24 sps:$4 sm:$0xff]  }
 0x22c   :  { %1968 = vmatpush1.bf16.msra.mxu1 %v2731_v40  ;;  %2050 = vmatpush1.bf16.msra.mxu0 %v2734_v41  ;;  %v2805_v40 = vld [vmem:[#allocation6 + $0x314] ss:$24 sps:$4 sm:$0xff]   ;;  %v2803_v41 = vld [vmem:[#allocation6 + $0x310] ss:$24 sps:$4 sm:$0xff]  }
 0x22d   :  { %1969 = vmatprep.subr.bf16.mxu1 %v2739_v42  ;;  %2051 = vmatprep.subr.bf16.mxu0 %v2742_v43  ;;  %v2808_v42 = vld [vmem:[#allocation6 + $0x344] ss:$24 sps:$4 sm:$0xff]   ;;  %v2806_v43 = vld [vmem:[#allocation6 + $0x340] ss:$24 sps:$4 sm:$0xff]  }
 0x230   :  { %1970 = vmatpush1.bf16.msra.mxu1 %v2737_v45  ;;  %2052 = vmatpush1.bf16.msra.mxu0 %v2740_v46  ;;  %v2811_v45 = vld [vmem:[#allocation6 + $0x374] ss:$24 sps:$4 sm:$0xff]   ;;  %v2809_v46 = vld [vmem:[#allocation6 + $0x370] ss:$24 sps:$4 sm:$0xff]  }
 0x231   :  { %1971 = vmatprep.subr.bf16.mxu1 %v2745_v48  ;;  %2053 = vmatprep.subr.bf16.mxu0 %v2748_v49  ;;  %v2814_v48 = vld [vmem:[#allocation6 + $0x3a4] ss:$24 sps:$4 sm:$0xff]   ;;  %v2812_v49 = vld [vmem:[#allocation6 + $0x3a0] ss:$24 sps:$4 sm:$0xff]  }
 0x232   :  { %v703_v58 = vpop.f32.mrb[8].mxu0 }
 0x233   :  { %v704_v59 = vadd.f32 %v703_v58, %v299_v51  ;;  %v705_v60 = vpop.f32.mrb[9].mxu0  ;;  %v2817_v51 = vld [vmem:[#allocation6 + $0x3d4] ss:$24 sps:$4 sm:$0xff]   ;;  %v2824_v58 = vld [vmem:[#allocation6 + $0x460] ss:$24 sps:$4 sm:$0xff]  }
 0x234   :  { %v706_v61 = vadd.f32 %v705_v60, %v303_v52  ;;  %v707_v62 = vpop.f32.mrb[10].mxu0  ;;  %1972 = vmatpush1.bf16.msra.mxu1 %v2743_v54  ;;  %2054 = vmatpush1.bf16.msra.mxu0 %v2746_v55  ;;  %v2815_v52 = vld [vmem:[#allocation6 + $0x3d0] ss:$24 sps:$4 sm:$0xff]   ;;  %v2820_v54 = vld [vmem:[#allocation6 + $0x404] ss:$24 sps:$4 sm:$0xff]  }
 0x235   :  { %v712_v1 = vmax.f32 %v704_v59, 0.0  ;;  %v708_v2 = vpop.f32.mrb[11].mxu0  ;;  %1973 = vmatprep.subr.bf16.mxu1 %v2751_v56  ;;  %2055 = vmatprep.subr.bf16.mxu0 %v2754_v57  ;;  %v2823_v55 = vld [vmem:[#allocation6 + $0x434] ss:$24 sps:$4 sm:$0xff]   ;;  %v2821_v56 = vld [vmem:[#allocation6 + $0x430] ss:$24 sps:$4 sm:$0xff]  }
 0x236   :  { %v713_v3 = vmax.f32 %v706_v61, 0.0  ;;  %v2826_v57 = vld [vmem:[#allocation6 + $0x464] ss:$24 sps:$4 sm:$0xff]   ;;  %v2829_v59 = vld [vmem:[#allocation6 + $0x494] ss:$24 sps:$4 sm:$0xff]  }
 0x237   :  { %v3091_v7 = vpack.c.bf16 %v712_v1, %v712_v1  ;;  %v2827_v60 = vld [vmem:[#allocation6 + $0x490] ss:$24 sps:$4 sm:$0xff]   ;;  %v2832_v61 = vld [vmem:[#allocation6 + $0x4c4] ss:$24 sps:$4 sm:$0xff]   ;;  %v2830_v62 = vld [vmem:[#allocation6 + $0x4c0] ss:$24 sps:$4 sm:$0xff]  }
 0x238   :  { %v3089_v4 = vpack.c.bf16 %v713_v3, %v713_v3  ;;  %1974 = vmatpush1.bf16.msra.mxu1 %v2749_v63  ;;  %2056 = vmatpush1.bf16.msra.mxu0 %v2752_v0  ;;  %v2835_v63 = vld [vmem:[#allocation6 + $0x4f4] ss:$24 sps:$4 sm:$0xff]   ;;  %v2833_v0 = vld [vmem:[#allocation6 + $0x4f0] ss:$24 sps:$4 sm:$0xff]   ;;  %v2838_v1 = vld [vmem:[#allocation6 + $0x524] ss:$24 sps:$4 sm:$0xff]  }
 0x239   :  { %2066 = vmatprep.subr.bf16.mxu1 %v2757_v39  ;;  %v2836_v2 = vld [vmem:[#allocation6 + $0x520] ss:$24 sps:$4 sm:$0xff]   ;;  %v2841_v39 = vld [vmem:[#allocation6 + $0x554] ss:$24 sps:$4 sm:$0xff]   ;;  %v2839_v3 = vld [vmem:[#allocation6 + $0x550] ss:$24 sps:$4 sm:$0xff]  }
 0x23a   :  { %1975 = vmatprep.mubr.bf16.mxu1 %v3089_v4  ;;  %2057 = vmatprep.mubr.bf16.mxu0 %v3089_v4 }
 0x23b   :  { %1976 = vmatmul.mubr.bf16.vlgmr.msra.gmra.mrb[4].mxu1 %v3091_v7  ;;  %2058 = vmatmul.mubr.bf16.vlgmr.msra.gmra.mrb[12].mxu0 %v3091_v7 }
 0x23c   :  { %2067 = vmatpush1.bf16.msra.mxu1 %v2755_v6  ;;  %2098 = vmatprep.mubr.bf16.mxu1 %v3073_v50  ;;  %v2773_v50 = vld [vmem:[#allocation6 + $0x130] ss:$24 sps:$4 sm:$0xff]   ;;  %v2842_v6 = vld [vmem:[#allocation6 + $0x580] ss:$24 sps:$4 sm:$0xff]  }
 0x23d   :  { %2068 = vmatprep.subr.bf16.mxu1 %v2760_v9  ;;  %v2847_v9 = vld [vmem:[#allocation6 + $0x5b4] ss:$24 sps:$4 sm:$0xff]  }
 0x240   :  { %2069 = vmatpush1.bf16.msra.mxu1 %v2758_v11  ;;  %v2845_v11 = vld [vmem:[#allocation6 + $0x5b0] ss:$24 sps:$4 sm:$0xff]  }
 0x241   :  { %2070 = vmatprep.subr.bf16.mxu1 %v2763_v12  ;;  %v2850_v12 = vld [vmem:[#allocation6 + $0x5e4] ss:$24 sps:$4 sm:$0xff]  }
 0x244   :  { %2071 = vmatpush1.bf16.msra.mxu1 %v2761_v13  ;;  %v2848_v13 = vld [vmem:[#allocation6 + $0x5e0] ss:$24 sps:$4 sm:$0xff]  }
 0x245   :  { %2072 = vmatprep.subr.bf16.mxu1 %v2766_v14  ;;  %v910_v14 = vld [vmem:[%s3138_s8] sm:$0x3f] }
 0x248   :  { %2073 = vmatpush1.bf16.msra.mxu1 %v2764_v15  ;;  %v915_v15 = vrot.slane %v910_v14, %v3050_v8 }
 0x249   :  { %2074 = vmatprep.subr.bf16.mxu1 %v2769_v16  ;;  %v923_v16 = vrot.slane %v910_v14, %v298_v44 }
 0x24c   :  { %2075 = vmatpush1.bf16.msra.mxu1 %v2767_v17  ;;  %v919_v17 = vrot.slane %v910_v14, %v3056_v10 }
 0x24d   :  { %2076 = vmatprep.subr.bf16.mxu1 %v2772_v18  ;;  %v927_v18 = vrot.slane %v910_v14, %v302_v47 }
 0x250   :  { %2077 = vmatpush1.bf16.msra.mxu1 %v2770_v19 }
 0x251   :  { %2078 = vmatprep.subr.bf16.mxu1 %v2775_v20 }
 0x254   :  { %2079 = vmatpush1.bf16.msra.mxu1 %v2773_v50 }
 0x255   :  { %2080 = vmatprep.subr.bf16.mxu1 %v2778_v21 }
 0x258   :  { %2081 = vmatpush1.bf16.msra.mxu1 %v2776_v22 }
 0x259   :  { %2082 = vmatprep.subr.bf16.mxu1 %v2781_v23 }
 0x25c   :  { %2083 = vmatpush1.bf16.msra.mxu1 %v2779_v24 }
 0x25d   :  { %2084 = vmatprep.subr.bf16.mxu1 %v2784_v25 }
 0x260   :  { %2085 = vmatpush1.bf16.msra.mxu1 %v2782_v26 }
 0x261   :  { %2086 = vmatprep.subr.bf16.mxu1 %v2787_v27 }
 0x264   :  { %2087 = vmatpush1.bf16.msra.mxu1 %v2785_v28 }
 0x265   :  { %2088 = vmatprep.subr.bf16.mxu1 %v2790_v29  ;;  %v930_v29 = vsub.s32 4, %v3047_v5 }
 0x268   :  { %2089 = vmatpush1.bf16.msra.mxu1 %v2788_v30  ;;  %v934_v30 = vsub.s32 5, %v3047_v5 }
 0x269   :  { %2090 = vmatprep.subr.bf16.mxu1 %v2793_v31  ;;  %v931_v31 = vrot.slane %v910_v14, %v930_v29 }
 0x26c   :  { %2091 = vmatpush1.bf16.msra.mxu1 %v2791_v32  ;;  %v935_v32 = vrot.slane %v910_v14, %v934_v30 }
 0x26d   :  { %2092 = vmatprep.subr.bf16.mxu1 %v2796_v33 }
 0x270   :  { %2093 = vmatpush1.bf16.msra.mxu1 %v2794_v34 }
 0x271   :  { %2094 = vmatprep.subr.bf16.mxu1 %v2799_v35 }
 0x274   :  { %2095 = vmatpush1.bf16.msra.mxu1 %v2797_v36 }
 0x275   :  { %2096 = vmatprep.subr.bf16.mxu1 %v2802_v37 }
 0x278   :  { %2097 = vmatpush1.bf16.msra.mxu1 %v2800_v38 }
 0x279   :  { %2107 = vmatprep.subr.bf16.mxu1 %v2805_v40 }
 0x27b   :  { %2099 = vmatmul.mubr.bf16.vlgmr.msra.gmra.mrb[8].mxu1 %v3075_v53  ;;  %v2818_v53 = vld [vmem:[#allocation6 + $0x400] ss:$24 sps:$4 sm:$0xff]  }
 0x27c   :  { %2108 = vmatpush1.bf16.msra.mxu1 %v2803_v41  ;;  %2139 = vmatprep.mubr.bf16.mxu1 %v3089_v4  ;;  %v2844_v4 = vld [vmem:[#allocation6 + $0x584] ss:$24 sps:$4 sm:$0xff]  }
 0x27d   :  { %2109 = vmatprep.subr.bf16.mxu1 %v2808_v42 }
 0x280   :  { %2110 = vmatpush1.bf16.msra.mxu1 %v2806_v43 }
 0x281   :  { %2111 = vmatprep.subr.bf16.mxu1 %v2811_v45 }
 0x284   :  { %2112 = vmatpush1.bf16.msra.mxu1 %v2809_v46 }
 0x285   :  { %2113 = vmatprep.subr.bf16.mxu1 %v2814_v48 }
 0x288   :  { %2114 = vmatpush1.bf16.msra.mxu1 %v2812_v49 }
 0x289   :  { %2115 = vmatprep.subr.bf16.mxu1 %v2817_v51 }
 0x28c   :  { %2116 = vmatpush1.bf16.msra.mxu1 %v2815_v52 }
 0x28d   :  { %2117 = vmatprep.subr.bf16.mxu1 %v2820_v54 }
 0x290   :  { %2118 = vmatpush1.bf16.msra.mxu1 %v2818_v53 }
 0x291   :  { %2119 = vmatprep.subr.bf16.mxu1 %v2823_v55 }
 0x294   :  { %2120 = vmatpush1.bf16.msra.mxu1 %v2821_v56 }
 0x295   :  { %2121 = vmatprep.subr.bf16.mxu1 %v2826_v57 }
 0x298   :  { %2122 = vmatpush1.bf16.msra.mxu1 %v2824_v58 }
 0x299   :  { %2123 = vmatprep.subr.bf16.mxu1 %v2829_v59 }
 0x29c   :  { %2124 = vmatpush1.bf16.msra.mxu1 %v2827_v60 }
 0x29d   :  { %2125 = vmatprep.subr.bf16.mxu1 %v2832_v61 }
 0x2a0   :  { %2126 = vmatpush1.bf16.msra.mxu1 %v2830_v62 }
 0x2a1   :  { %2127 = vmatprep.subr.bf16.mxu1 %v2835_v63 }
 0x2a4   :  { %2128 = vmatpush1.bf16.msra.mxu1 %v2833_v0 }
 0x2a5   :  { %2129 = vmatprep.subr.bf16.mxu1 %v2838_v1 }
 0x2a8   :  { %2130 = vmatpush1.bf16.msra.mxu1 %v2836_v2 }
 0x2a9   :  { %2131 = vmatprep.subr.bf16.mxu1 %v2841_v39 }
 0x2ac   :  { %2132 = vmatpush1.bf16.msra.mxu1 %v2839_v3 }
 0x2ad   :  { %2133 = vmatprep.subr.bf16.mxu1 %v2844_v4 }
 0x2b0   :  { %2134 = vmatpush1.bf16.msra.mxu1 %v2842_v6 }
 0x2b1   :  { %2135 = vmatprep.subr.bf16.mxu1 %v2847_v9 }
 0x2b4   :  { %2136 = vmatpush1.bf16.msra.mxu1 %v2845_v11 }
 0x2b5   :  { %2137 = vmatprep.subr.bf16.mxu1 %v2850_v12 }
 0x2b8   :  { %2138 = vmatpush1.bf16.msra.mxu1 %v2848_v13 }
 0x2bb   :  { %2140 = vmatmul.mubr.bf16.vlgmr.msra.gmra.mrb[8].mxu1 %v3091_v7 }
 0x30e   :  { %v1977_v19 = vpop.f32.mrb[4].mxu1  ;;  %v2059_v20 = vpop.f32.mrb[12].mxu0 }
 0x30f   :  { %v2430_v50 = vadd.f32 %v1977_v19, %v915_v15  ;;  %v2432_v21 = vadd.f32 %v2059_v20, %v923_v16  ;;  %v1979_v22 = vpop.f32.mrb[5].mxu1  ;;  %v2061_v7 = vpop.f32.mrb[13].mxu0 }
 0x310   :  { %v2431_v23 = vadd.f32 %v1979_v22, %v919_v17  ;;  %v2433_v24 = vadd.f32 %v2061_v7, %v927_v18  ;;  %v1981_v25 = vpop.f32.mrb[6].mxu1  ;;  %v2063_v26 = vpop.f32.mrb[14].mxu0 }
 0x311   :  { %2851 = vtanh.f32 %v2430_v50  ;;  %v1982_v8 = vpop.f32.mrb[7].mxu1  ;;  %v2064_v27 = vpop.f32.mrb[15].mxu0 }
 0x312   :  { %2853 = vtanh.f32 %v2432_v21 }
 0x313   :  { %2855 = vtanh.f32 %v2431_v23 }
 0x314   :  { %2857 = vtanh.f32 %v2433_v24 }
 0x31b   :  { %v2852_v10 = vpop.eup %2851 }
 0x31c   :  { %v2854_v44 = vpop.eup %2853  ;;  %2154 = vst [vmem:[%s3139_s9] sm:$0xff] %v2852_v10 }
 0x31d   :  { %v2856_v47 = vpop.eup %2855  ;;  %2156 = vst [vmem:[%s3139_s9 + $0x10] sm:$0xff] %v2854_v44 }
 0x31e   :  { %v2858_v28 = vpop.eup %2857  ;;  %2155 = vst [vmem:[%s3139_s9 + $0x8] sm:$0xff] %v2856_v47 }
 0x31f   :  { %2157 = vst [vmem:[%s3139_s9 + $0x18] sm:$0xff] %v2858_v28 }
 0x38e   :  { %v2141_v33 = vpop.f32.mrb[8].mxu1 }
 0x38f   :  { %v2434_v34 = vadd.f32 %v2141_v33, %v931_v31  ;;  %v2143_v35 = vpop.f32.mrb[9].mxu1 }
 0x390   :  { %v2435_v36 = vadd.f32 %v2143_v35, %v935_v32  ;;  %v2145_v37 = vpop.f32.mrb[10].mxu1 }
 0x391   :  { %2859 = vtanh.f32 %v2434_v34  ;;  %v2146_v38 = vpop.f32.mrb[11].mxu1 }
 0x392   :  { %2861 = vtanh.f32 %v2435_v36 }
 0x39b   :  { %v2860_v40 = vpop.eup %2859 }
 0x39c   :  { %v2862_v41 = vpop.eup %2861  ;;  %2158 = vst [vmem:[%s3139_s9 + $0x20] sm:$0xff] %v2860_v40 }
 0x39d   :  { %2159 = vst [vmem:[%s3139_s9 + $0x28] sm:$0xff] %v2862_v41 }
 0x39e   :  { %2164 = vsyncpa [#allocation3], 1 }
 0x39f   :  { %2165 = vsyncpa [#allocation5], 1 }

</bundles_post_ra>
